<compile_context>
chip_gen: v7x
topology: tpu7x:2x2x1
jax: 0.10.0
libtpu: 0.0.40
codegen_flags: <defaults>
</compile_context>

<pallas_src>
import math

import jax
import jax.numpy as jnp
from jax.experimental import pallas as pl
from jax.experimental.pallas import tpu as pltpu


def _affine1d_kernel(x_ref, c_ref, o_ref):
    # out = coef * x, coef = weight + exp(bias) pre-folded in the wrapper.
    # coef's dtype selects the compute dtype (f32 on v5e / f32 inputs, native
    # bf16 on v6e/v7x); the casts are no-ops when dtypes already match.
    x = x_ref[...]                        # (tm, tn)
    c = c_ref[...]                        # (1, tn), broadcast over rows
    o_ref[...] = (x.astype(c.dtype) * c).astype(o_ref.dtype)


def _tpu_generation_params():
    """Returns (vmem_budget_bytes, vmem_limit_cap_bytes, num_tensorcores)."""
    vmem_cap = 128 << 20
    try:
        info = pltpu.get_tpu_info()
        vmem_cap = int(getattr(info, "vmem_capacity_bytes", vmem_cap))
    except Exception:
        pass
    if vmem_cap <= (96 << 20):
        # v7x-like: 64 MiB VMEM per TensorCore, 2 TensorCores per chip.
        return 34 << 20, 40 << 20, 2
    # v5e / v6e: 128 MiB VMEM, 1 TensorCore.
    return 44 << 20, 64 << 20, 1


def _native_compute_ok():
    # v5e has no bf16 VALU -> keep f32 compute there; v6e/v7x multiply natively.
    try:
        kind = jax.devices()[0].device_kind.lower()
        return not ("v5 lite" in kind or "v5e" in kind or "v5lite" in kind)
    except Exception:
        return False


def affine_transform_1d(x, weight, bias, *, tm=4096):
    """x: (..., scale); weight flattens to (scale,) (PyTorch uses (1,1,scale));
    bias: (scale,).  Returns weight*x + exp(bias)*x with x's shape/dtype."""
    scale = x.shape[-1]
    w = jnp.reshape(weight, (-1,))
    assert w.shape == (scale,), f"weight has {w.shape[0]} elems, expected {scale}"
    assert bias.shape == (scale,), f"bias shape {bias.shape} != ({scale},)"

    lead = x.shape[:-1]
    rows = int(math.prod(lead)) if lead else 1
    if rows == 0 or scale == 0:
        return x                                     # empty input: nothing to do

    # Fold the (tiny, loop-invariant) parameter math once in the wrapper.
    coef = w.astype(jnp.float32) + jnp.exp(bias.astype(jnp.float32))
    native = (_native_compute_ok() and jnp.issubdtype(x.dtype, jnp.floating)
              and x.dtype != jnp.float32)
    # (If native bf16 compute is used, coef is rounded to bf16 once: <=1 ulp.)
    coef = coef.astype(x.dtype if native else jnp.float32).reshape(1, scale)

    x2 = x.reshape(rows, scale)
    rows_eff, scale_eff = rows, scale

    # --- lane-density guard: fold rows into lanes if scale isn't 128-friendly.
    if scale % 128 != 0:
        k = 128 // math.gcd(scale, 128)              # k*scale is a multiple of 128
        if k > 1 and rows % k == 0:
            rows_eff = rows // k
            scale_eff = k * scale
            x2 = x2.reshape(rows_eff, scale_eff)
            coef = jnp.tile(coef, (1, k))
    # (If the fold does not apply, scale stays a single full-extent block.)

    # --- generation-aware tile selection -------------------------------------
    itemsize = jnp.dtype(x2.dtype).itemsize
    sub = 8 * max(1, 4 // itemsize)                  # sublane packing: 8/16/32
    vmem_budget, vmem_cap, num_tc = _tpu_generation_params()

    def footprint(m, n):                             # double-buffered in + out
        return 4 * m * n * itemsize

    tm_eff = max(sub, tm)
    tn = scale_eff
    # Shrink the row tile first, but not below ~256 rows.
    while tm_eff > max(256, sub) and footprint(tm_eff, tn) > vmem_budget:
        tm_eff //= 2
    # Very large feature dim: tile the lane axis instead of starving the rows.
    if (footprint(tm_eff, tn) > vmem_budget and scale_eff > 128
            and scale_eff % 128 == 0):
        tn = max(128, min(scale_eff,
                          (vmem_budget // (4 * tm_eff * itemsize)) // 128 * 128))
    while tm_eff > sub and footprint(tm_eff, tn) > vmem_budget:
        tm_eff //= 2

    if rows_eff > tm_eff:
        tm_eff = max(sub, (tm_eff // sub) * sub)     # sublane-aligned blocks
    elif num_tc >= 2 and rows_eff >= 2 * sub:
        # Whole input fits in one tile on a 2-TensorCore chip: split into 2
        # grid steps so the "parallel" axis can shard across both cores.
        half = (rows_eff + 1) // 2
        tm_eff = ((half + sub - 1) // sub) * sub
        if tm_eff >= rows_eff:
            tm_eff = rows_eff
    else:
        tm_eff = rows_eff                            # single full-extent block

    grid = (pl.cdiv(rows_eff, tm_eff), pl.cdiv(scale_eff, tn))

    vmem_limit = int(min(max(footprint(tm_eff, tn) + 4 * tn * itemsize
                             + (2 << 20), 16 << 20), vmem_cap))

    cost = pl.CostEstimate(
        flops=rows_eff * scale_eff,
        transcendentals=0,
        bytes_accessed=(2 * rows_eff * scale_eff * itemsize
                        + scale_eff * jnp.dtype(coef.dtype).itemsize))

    out2 = pl.pallas_call(
        _affine1d_kernel,
        out_shape=jax.ShapeDtypeStruct((rows_eff, scale_eff), x.dtype),
        grid_spec=pltpu.PrefetchScalarGridSpec(
            num_scalar_prefetch=0,
            grid=grid,
            in_specs=[
                pl.BlockSpec((tm_eff, tn), lambda i, j: (i, j)),
                pl.BlockSpec((1, tn), lambda i, j: (0, j)),
            ],
            out_specs=pl.BlockSpec((tm_eff, tn), lambda i, j: (i, j)),
        ),
        compiler_params=pltpu.CompilerParams(
            dimension_semantics=("parallel", "parallel"),
            vmem_limit_bytes=vmem_limit),
        cost_estimate=cost,
    )(x2, coef)

    return out2.reshape(x.shape)


if __name__ == "__main__":
    scale = 512          # module default
    batch, seq = 2, 16   # small demo shapes: x is (batch, seq, scale)

    key = jax.random.PRNGKey(0)
    kx, kw, kb = jax.random.split(key, 3)

    x = jax.random.normal(kx, (batch, seq, scale), dtype=jnp.float32)
    # nn.Parameter(torch.zeros(...)) init, perturbed so the test exercises
    # nontrivial values.
    weight = jnp.zeros((1, 1, scale), jnp.float32) + 0.01 * jax.random.normal(
        kw, (1, 1, scale), dtype=jnp.float32)
    bias = jnp.zeros((scale,), jnp.float32) + 0.01 * jax.random.normal(
        kb, (scale,), dtype=jnp.float32)

    out = jax.block_until_ready(affine_transform_1d(x, weight, bias))

    # Pure-JAX reference of the PyTorch forward: weight*x + exp(bias)*x.
    ref = weight * x + jnp.exp(bias) * x
    assert out.shape == x.shape and out.dtype == x.dtype
    assert jnp.allclose(out, ref, atol=1e-5, rtol=1e-5)

    print("KERNEL_OK")
</pallas_src>

<mosaic_0001>
module attributes {stable_mosaic.version = 11 : i64} {
  func.func @_affine1d_kernel(%arg0: i32, %arg1: i32, %arg2: memref<32x512xf32, #tpu.memory_space<vmem>>, %arg3: memref<1x512xf32, #tpu.memory_space<vmem>>, %arg4: memref<32x512xf32, #tpu.memory_space<vmem>>) attributes {dimension_semantics = [#tpu.dimension_semantics<parallel>, #tpu.dimension_semantics<parallel>], iteration_bounds = array<i64: 1, 1>, scalar_prefetch = 0 : i64, scratch_operands = 0 : i64, tpu.core_type = #tpu.core_type<tc>, window_params = [{transform_indices = @transform_0, window_bounds = array<i64: 32, 512>}, {transform_indices = @transform_1, window_bounds = array<i64: 1, 512>}, {transform_indices = @transform_2, window_bounds = array<i64: 32, 512>}]} {
    %c0 = arith.constant 0 : index
    %c0_0 = arith.constant 0 : index
    %0 = vector.load %arg2[%c0, %c0_0] : memref<32x512xf32, #tpu.memory_space<vmem>>, vector<32x512xf32>
    %c0_1 = arith.constant 0 : index
    %c0_2 = arith.constant 0 : index
    %1 = vector.load %arg3[%c0_1, %c0_2] : memref<1x512xf32, #tpu.memory_space<vmem>>, vector<1x512xf32>
    %2 = vector.broadcast %1 : vector<1x512xf32> to vector<32x512xf32>
    %3 = arith.mulf %0, %2 : vector<32x512xf32>
    %c0_3 = arith.constant 0 : index
    %c0_4 = arith.constant 0 : index
    %4 = vector.load %arg4[%c0_3, %c0_4] : memref<32x512xf32, #tpu.memory_space<vmem>>, vector<32x512xf32>
    tpu.vector_store %arg4[%c0_3, %c0_4], %3 {strides = array<i32>} : memref<32x512xf32, #tpu.memory_space<vmem>>, vector<32x512xf32>,
    return
  }
  func.func @transform_0(%arg0: i32, %arg1: i32) -> (i32, i32) {
    %c0_i32 = arith.constant 0 : i32
    return %arg0, %arg1 : i32, i32
  }
  func.func @transform_1(%arg0: i32, %arg1: i32) -> (i32, i32) {
    %c0_i32 = arith.constant 0 : i32
    %c0_i32_0 = arith.constant 0 : i32
    return %c0_i32, %arg1 : i32, i32
  }
  func.func @transform_2(%arg0: i32, %arg1: i32) -> (i32, i32) {
    %c0_i32 = arith.constant 0 : i32
    return %arg0, %arg1 : i32, i32
  }
}

</mosaic_0001>

<bundles_post_ra>
// kernel: tpu_custom_call.1
= control target key start
LH: loop header
LB: loop body
LE: loop exit
PB: predicated region body
PF: predicated region fallthrough
CT: control target
= control target key end

     0   :  { %7 = vsyncpa [#allocation3], 0  ;;  %s265_s0 = inlined_call_operand.hbm [shape: f32[32,512], index: 0, kind: input, shape index: {}]   ;;  %s266_s1 = inlined_call_operand.hbm [shape: f32[1,512], index: 1, kind: input, shape index: {}]   ;;  %s267_s2 = inlined_call_operand.hbm [shape: f32[32,512], index: 2, kind: output, shape index: {}]  }
   0x1   :  { %8 = vsyncpa [#allocation6], 0 }
   0x2   :  { %9 = vsyncpa [#allocation4], 0  ;;  %s203_s9 = smov [#allocation2]   ;;  %s131_s13 = scalar_lea.hbm %s265_s0, 2048 }
   0x3   :  { %s15_s10 = sshll.u32 %s203_s9, 4  ;;  %p132_p0 = scmp.ne.s32.totalorder %s265_s0, %s131_s13  ;;  %s16_s10 = int_to_ptr.vmem [resolvable:$true] %s15_s10 }
   0x4   :  { %p135_p1 = scmp.lt.u32.totalorder %s131_s13, %s265_s0 }
   0x6   :  { %p137_p2 = pnand %p135_p1, %p132_p0 }
   0x8   :  { %140 = shalt.err (!%p137_p2)
}
   0x9   :  { %s141_s18 = scalar_lea.vmem %s16_s10, 2048  ;;  %p146_p4 = scmp.lt.s32.totalorder %s16_s10, %s16_s10 }
   0xa   :  { %p142_p3 = scmp.ne.s32.totalorder %s16_s10, %s141_s18  ;;  %p147_p5 = scmp.lt.s32.totalorder %s141_s18, %s141_s18 }
   0xc   :  { %p148_p6 = por %p147_p5, %p146_p4 }
   0xe   :  { %p149_p7 = pnand %p148_p6, %p142_p3 }
  0x10   :  { %152 = shalt.err (!%p149_p7)
}
  0x11   :  { %s204_s19 = smov 512   ;;  %s205_s20 = smov 32  }
  0x12   :  { %21 = dma.hbm_to_vmem [thread:$0]  %s265_s0, 2048, %s16_s10, [#allocation3], %s204_s19, %s204_s19, %s205_s20  }
  0x13   :  { %s206_s23 = smov [#allocation5]   ;;  %s153_s27 = scalar_lea.hbm %s266_s1, 64 }
  0x14   :  { %s28_s24 = sshll.u32 %s206_s23, 4  ;;  %p154_p8 = scmp.ne.s32.totalorder %s266_s1, %s153_s27  ;;  %s29_s24 = int_to_ptr.vmem [resolvable:$true] %s28_s24 }
  0x15   :  { %p157_p9 = scmp.lt.u32.totalorder %s153_s27, %s266_s1 }
  0x17   :  { %p159_p10 = pnand %p157_p9, %p154_p8 }
  0x19   :  { %162 = shalt.err (!%p159_p10)
}
  0x1a   :  { %s163_s4 = scalar_lea.vmem %s29_s24, 64  ;;  %p168_p12 = scmp.lt.s32.totalorder %s29_s24, %s29_s24 }
  0x1b   :  { %p164_p11 = scmp.ne.s32.totalorder %s29_s24, %s163_s4  ;;  %p169_p13 = scmp.lt.s32.totalorder %s163_s4, %s163_s4 }
  0x1d   :  { %p170_p0 = por %p169_p13, %p168_p12 }
  0x1f   :  { %p171_p1 = pnand %p170_p0, %p164_p11 }
  0x21   :  { %174 = shalt.err (!%p171_p1)
}
  0x22   :  { %31 = dma.hbm_to_vmem [thread:$0]  %s266_s1, 64, %s29_s24, [#allocation6]  }
  0x23   :  { %197 = dma.done.wait [#allocation3], 2048  }
  0x24   :  { %198 = vsyncadd [#allocation3], 4294965248 }
  0x25   :  { %199 = dma.done.wait [#allocation6], 64  }
  0x26   :  { %200 = vsyncadd [#allocation6], 4294967232  ;;  %v56_v0 = vlaneseq  ;;  %v38_v6 = vld [vmem:[#allocation2] sm:$0xff]  ;;  %v39_v8 = vld [vmem:[#allocation2 + $0x8] sm:$0xff]  ;;  %s207_s1 = smov [#allocation7]  }
  0x27   :  { %v54_v7 = vld [vmem:[#allocation5] sm:$0xf]  ;;  %v40_v11 = vld [vmem:[#allocation2 + $0x10] sm:$0xff]  ;;  %v41_v13 = vld [vmem:[#allocation2 + $0x18] sm:$0xff]  ;;  %s113_s6 = sshll.u32 %s207_s1, 4  ;;  %s114_s6 = int_to_ptr.vmem [resolvable:$true] %s113_s6 }
  0x28   :  { %v57_v1 = vshrl.u32 %v56_v0, 7  ;;  %v42_v15 = vld [vmem:[#allocation2 + $0x20] sm:$0xff]  ;;  %v43_v16 = vld [vmem:[#allocation2 + $0x28] sm:$0xff]  ;;  %v44_v17 = vld [vmem:[#allocation2 + $0x30] sm:$0xff]  ;;  %s175_s7 = scalar_lea.vmem %s114_s6, 2048  ;;  %p180_p3 = scmp.lt.s32.totalorder %s114_s6, %s114_s6 }
  0x29   :  { %v45_v18 = vld [vmem:[#allocation2 + $0x38] sm:$0xff]  ;;  %v46_v23 = vld [vmem:[#allocation2 + $0x40] sm:$0xff]  ;;  %v47_v24 = vld [vmem:[#allocation2 + $0x48] sm:$0xff]  ;;  %p176_p2 = scmp.ne.s32.totalorder %s114_s6, %s175_s7  ;;  %p181_p4 = scmp.lt.s32.totalorder %s175_s7, %s175_s7 }
  0x2a   :  { %v58_v2 = vsub.s32 0, %v57_v1  ;;  %v62_v3 = vsub.s32 1, %v57_v1  ;;  %v66_v4 = vsub.s32 2, %v57_v1  ;;  %v70_v5 = vsub.s32 3, %v57_v1  ;;  %v48_v25 = vld [vmem:[#allocation2 + $0x50] sm:$0xff]  ;;  %v49_v30 = vld [vmem:[#allocation2 + $0x58] sm:$0xff] }
  0x2b   :  { %v50_v31 = vld [vmem:[#allocation2 + $0x60] sm:$0xff]  ;;  %v51_v32 = vld [vmem:[#allocation2 + $0x68] sm:$0xff]  ;;  %v52_v37 = vld [vmem:[#allocation2 + $0x70] sm:$0xff]  ;;  %p182_p5 = por %p181_p4, %p180_p3 }
  0x2c   :  { %v59_v9 = vrot.slane %v54_v7, %v58_v2  ;;  %v63_v10 = vrot.slane %v54_v7, %v62_v3  ;;  %v67_v12 = vrot.slane %v54_v7, %v66_v4  ;;  %v71_v14 = vrot.slane %v54_v7, %v70_v5  ;;  %v53_v38 = vld [vmem:[#allocation2 + $0x78] sm:$0xff] }
  0x2d   :  { %p183_p6 = pnand %p182_p5, %p176_p2 }
  0x2e   :  { %v76_v19 = vmul.f32 %v59_v9, %v38_v6  ;;  %v77_v20 = vmul.f32 %v63_v10, %v39_v8  ;;  %v78_v21 = vmul.f32 %v67_v12, %v40_v11  ;;  %v79_v22 = vmul.f32 %v71_v14, %v41_v13 }
  0x2f   :  { %v80_v26 = vmul.f32 %v59_v9, %v42_v15  ;;  %v81_v27 = vmul.f32 %v63_v10, %v43_v16  ;;  %v82_v28 = vmul.f32 %v67_v12, %v44_v17  ;;  %v83_v29 = vmul.f32 %v71_v14, %v45_v18 }
  0x30   :  { %92 = vst [vmem:[#allocation7] sm:$0xff] %v76_v19  ;;  %93 = vst [vmem:[#allocation7 + $0x8] sm:$0xff] %v77_v20  ;;  %v84_v33 = vmul.f32 %v59_v9, %v46_v23  ;;  %v85_v34 = vmul.f32 %v63_v10, %v47_v24  ;;  %v86_v35 = vmul.f32 %v67_v12, %v48_v25 }
  0x31   :  { %94 = vst [vmem:[#allocation7 + $0x10] sm:$0xff] %v78_v21  ;;  %95 = vst [vmem:[#allocation7 + $0x18] sm:$0xff] %v79_v22  ;;  %v87_v36 = vmul.f32 %v71_v14, %v49_v30  ;;  %v88_v39 = vmul.f32 %v59_v9, %v50_v31  ;;  %v89_v40 = vmul.f32 %v63_v10, %v51_v32 }
  0x32   :  { %96 = vst [vmem:[#allocation7 + $0x20] sm:$0xff] %v80_v26  ;;  %97 = vst [vmem:[#allocation7 + $0x28] sm:$0xff] %v81_v27  ;;  %v90_v41 = vmul.f32 %v67_v12, %v52_v37  ;;  %v91_v42 = vmul.f32 %v71_v14, %v53_v38 }
  0x33   :  { %98 = vst [vmem:[#allocation7 + $0x30] sm:$0xff] %v82_v28  ;;  %99 = vst [vmem:[#allocation7 + $0x38] sm:$0xff] %v83_v29 }
  0x34   :  { %100 = vst [vmem:[#allocation7 + $0x40] sm:$0xff] %v84_v33  ;;  %101 = vst [vmem:[#allocation7 + $0x48] sm:$0xff] %v85_v34 }
  0x35   :  { %102 = vst [vmem:[#allocation7 + $0x50] sm:$0xff] %v86_v35  ;;  %103 = vst [vmem:[#allocation7 + $0x58] sm:$0xff] %v87_v36 }
  0x36   :  { %104 = vst [vmem:[#allocation7 + $0x60] sm:$0xff] %v88_v39  ;;  %105 = vst [vmem:[#allocation7 + $0x68] sm:$0xff] %v89_v40 }
  0x37   :  { %106 = vst [vmem:[#allocation7 + $0x70] sm:$0xff] %v90_v41  ;;  %107 = vst [vmem:[#allocation7 + $0x78] sm:$0xff] %v91_v42 }
  0x38   :  { %186 = shalt.err (!%p183_p6)
}
  0x39   :  { %s187_s10 = scalar_lea.hbm %s267_s2, 2048 }
  0x3a   :  { %p188_p7 = scmp.ne.s32.totalorder %s267_s2, %s187_s10  ;;  %p191_p8 = scmp.lt.u32.totalorder %s187_s10, %s267_s2 }
  0x3c   :  { %p193_p9 = pnand %p191_p8, %p188_p7 }
  0x3e   :  { %196 = shalt.err (!%p193_p9)
}
  0x3f   :  { %119 = dma.vmem_to_hbm [thread:$0]  %s114_s6, 2048, %s267_s2, [#allocation4], %s204_s19, %s204_s19, %s205_s20  }
  0x40   :  { %201 = dma.done.wait [#allocation4], 2048  }
  0x41   :  { %202 = vsyncadd [#allocation4], 4294965248 }
  0x42   :  { %123 = vsyncpa [#allocation3], 1 }
  0x43   :  { %124 = vsyncpa [#allocation6], 1 }
  0x44   :  { %125 = vsyncpa [#allocation4], 1 }

</bundles_post_ra>
